<compile_context>
chip_gen: v5e
topology: v5e:2x2
jax: 0.10.0
libtpu: 0.0.40
codegen_flags: <defaults>
</compile_context>

<pallas_src>
import functools

import jax
import jax.numpy as jnp
from jax.experimental import pallas as pl
from jax.experimental.pallas import tpu as pltpu


def _round_up(n, m):
    return ((n + m - 1) // m) * m


def _choose_tb(B, block_batch):
    """Batch-tile rows per grid step.

    Multiple of 16 (bf16 sublane packing). For large batches cap near
    ceil(B/4) so the grid has >= 2 steps and v7x's two TensorCores both get
    work; for small batches use a single small tile.
    """
    b16 = _round_up(max(B, 1), 16)
    tb = min(_round_up(block_batch, 16), b16)
    if b16 >= 64:  # enough rows for a megacore split to be worthwhile
        tb = min(tb, _round_up(pl.cdiv(b16, 4), 16))
    return max(tb, 16)


def qnetwork_kernel(x_ref, w1_ref, b1_ref, w2_ref, b2_ref, w3_ref, b3_ref, o_ref):
    cd = w1_ref.dtype                                  # compute dtype (bf16 or f32)
    x = x_ref[...].astype(cd)                          # (TB, S)

    # fc1 + relu (K = state_size is tiny -> MXU-latency bound)
    h1 = jnp.dot(x, w1_ref[...], preferred_element_type=jnp.float32) + b1_ref[...]
    h1 = jnp.maximum(h1, 0.0)

    # fc2 + relu (dominant matmul once batched)
    h2 = jnp.dot(h1.astype(cd), w2_ref[...],
                 preferred_element_type=jnp.float32) + b2_ref[...]
    h2 = jnp.maximum(h2, 0.0)

    # fc3: narrow output (action_size lanes); masked store of a few lanes is cheap.
    o_ref[...] = (jnp.dot(h2.astype(cd), w3_ref[...],
                          preferred_element_type=jnp.float32)
                  + b3_ref[...]).astype(o_ref.dtype)


def prepare_params(params, compute_dtype=jnp.bfloat16):
    """One-time (outside the hot path) cast of weights to the compute dtype.

    Biases stay f32 (added to the f32 MXU accumulator).
    """
    return dict(
        w1=params["w1"].astype(compute_dtype), b1=params["b1"].astype(jnp.float32),
        w2=params["w2"].astype(compute_dtype), b2=params["b2"].astype(jnp.float32),
        w3=params["w3"].astype(compute_dtype), b3=params["b3"].astype(jnp.float32),
    )


@functools.partial(jax.jit, static_argnames=("block_batch",))
def qnetwork_forward(x, prepared, *, block_batch=4096):
    """x: (B, state_size) f32.  prepared: output of prepare_params()."""
    w1, b1 = prepared["w1"], prepared["b1"]
    w2, b2 = prepared["w2"], prepared["b2"]
    w3, b3 = prepared["w3"], prepared["b3"]

    B, state_size = x.shape
    action_size = w3.shape[1]

    # --- batch tiling (only pad when the tile doesn't divide B) -------------
    tb = _choose_tb(B, block_batch)
    b_pad = _round_up(B, tb)
    if b_pad != B:
        x = jnp.pad(x, ((0, b_pad - B), (0, 0)))

    resident = lambda a: pl.BlockSpec(a.shape, lambda i: (0,) * a.ndim)

    out = pl.pallas_call(
        qnetwork_kernel,
        out_shape=jax.ShapeDtypeStruct((b_pad, action_size), jnp.float32),
        grid=(b_pad // tb,),
        in_specs=[
            pl.BlockSpec((tb, state_size), lambda i: (i, 0)),   # x: tiled over batch
            resident(w1), resident(b1),                         # weights/biases stay
            resident(w2), resident(b2),                         # resident in VMEM
            resident(w3), resident(b3),
        ],
        out_specs=pl.BlockSpec((tb, action_size), lambda i: (i, 0)),
        compiler_params=pltpu.CompilerParams(
            dimension_semantics=("parallel",)),                 # megacore on v7x
    )(x, w1, b1, w2, b2, w3, b3)

    return out if b_pad == B else out[:B]


def init_params(key, state_size, action_size, fc1_units=128, fc2_units=128):
    """Deterministic init mimicking PyTorch nn.Linear default (U[-1/sqrt(fan_in), +])."""
    def linear(k, fan_in, fan_out):
        kw, kb = jax.random.split(k)
        bound = 1.0 / jnp.sqrt(fan_in)
        # stored transposed vs. PyTorch: (in, out)
        w = jax.random.uniform(kw, (fan_in, fan_out), jnp.float32, -bound, bound)
        b = jax.random.uniform(kb, (1, fan_out), jnp.float32, -bound, bound)
        return w, b

    k1, k2, k3 = jax.random.split(key, 3)
    w1, b1 = linear(k1, state_size, fc1_units)
    w2, b2 = linear(k2, fc1_units, fc2_units)
    w3, b3 = linear(k3, fc2_units, action_size)
    return dict(w1=w1, b1=b1, w2=w2, b2=b2, w3=w3, b3=b3)


def reference_forward(x, p, compute_dtype=jnp.float32):
    """Pure-JAX reference with the same compute-dtype strategy as the kernel."""
    cd = compute_dtype
    h1 = jnp.maximum(
        jnp.dot(x.astype(cd), p["w1"].astype(cd),
                preferred_element_type=jnp.float32) + p["b1"], 0.0)
    h2 = jnp.maximum(
        jnp.dot(h1.astype(cd), p["w2"].astype(cd),
                preferred_element_type=jnp.float32) + p["b2"], 0.0)
    return jnp.dot(h2.astype(cd), p["w3"].astype(cd),
                   preferred_element_type=jnp.float32) + p["b3"]


if __name__ == "__main__":
    key = jax.random.PRNGKey(0)
    kp, kx = jax.random.split(key)

    batch = 2
    state_size = 8
    action_size = 4

    params = init_params(kp, state_size, action_size)
    prepared = prepare_params(params, compute_dtype=jnp.bfloat16)   # hoisted cast
    x = jax.random.normal(kx, (batch, state_size), jnp.float32)

    out = qnetwork_forward(x, prepared)
    out = jax.block_until_ready(out)
    assert out.shape == (batch, action_size)

    # Exact check vs. a reference using the same bf16-in / f32-accumulate math.
    ref_matched = reference_forward(x, params, compute_dtype=jnp.bfloat16)
    assert jnp.allclose(out, ref_matched, atol=1e-4, rtol=1e-4), \
        "mismatch vs bf16-matched reference"

    # Sanity check vs. the pure-f32 PyTorch-equivalent forward (bf16 rounding
    # of inputs/weights gives ~0.4% relative error per layer).
    ref_f32 = reference_forward(x, params, compute_dtype=jnp.float32)
    assert jnp.allclose(out, ref_f32, atol=3e-2, rtol=3e-2), \
        "mismatch vs f32 reference"

    # Exercise the multi-step grid path (megacore split on v7x) as well.
    xb = jax.random.normal(kx, (1000, state_size), jnp.float32)
    outb = jax.block_until_ready(qnetwork_forward(xb, prepared))
    refb = reference_forward(xb, params, compute_dtype=jnp.bfloat16)
    assert outb.shape == (1000, action_size)
    assert jnp.allclose(outb, refb, atol=1e-4, rtol=1e-4), \
        "mismatch vs bf16-matched reference (batched)"

    print("KERNEL_OK")
</pallas_src>

<mosaic_0001>
module attributes {stable_mosaic.version = 11 : i64} {
  func.func @qnetwork_kernel(%arg0: i32, %arg1: memref<16x8xf32, #tpu.memory_space<vmem>>, %arg2: memref<8x128xbf16, #tpu.memory_space<vmem>>, %arg3: memref<1x128xf32, #tpu.memory_space<vmem>>, %arg4: memref<128x128xbf16, #tpu.memory_space<vmem>>, %arg5: memref<1x128xf32, #tpu.memory_space<vmem>>, %arg6: memref<128x4xbf16, #tpu.memory_space<vmem>>, %arg7: memref<1x4xf32, #tpu.memory_space<vmem>>, %arg8: memref<16x4xf32, #tpu.memory_space<vmem>>) attributes {dimension_semantics = [#tpu.dimension_semantics<parallel>], iteration_bounds = array<i64: 1>, scalar_prefetch = 0 : i64, scratch_operands = 0 : i64, tpu.core_type = #tpu.core_type<tc>, window_params = [{transform_indices = @transform_0, window_bounds = array<i64: 16, 8>}, {pipeline_mode = #tpu.pipeline_mode<synchronous>, transform_indices = @transform_1, window_bounds = array<i64: 8, 128>}, {pipeline_mode = #tpu.pipeline_mode<synchronous>, transform_indices = @transform_2, window_bounds = array<i64: 1, 128>}, {pipeline_mode = #tpu.pipeline_mode<synchronous>, transform_indices = @transform_3, window_bounds = array<i64: 128, 128>}, {pipeline_mode = #tpu.pipeline_mode<synchronous>, transform_indices = @transform_4, window_bounds = array<i64: 1, 128>}, {pipeline_mode = #tpu.pipeline_mode<synchronous>, transform_indices = @transform_5, window_bounds = array<i64: 128, 4>}, {pipeline_mode = #tpu.pipeline_mode<synchronous>, transform_indices = @transform_6, window_bounds = array<i64: 1, 4>}, {transform_indices = @transform_7, window_bounds = array<i64: 16, 4>}]} {
    %c0 = arith.constant 0 : index
    %c0_0 = arith.constant 0 : index
    %0 = vector.load %arg1[%c0, %c0_0] : memref<16x8xf32, #tpu.memory_space<vmem>>, vector<16x8xf32>
    %1 = arith.truncf %0 : vector<16x8xf32> to vector<16x8xbf16>
    %c0_1 = arith.constant 0 : index
    %c0_2 = arith.constant 0 : index
    %2 = vector.load %arg2[%c0_1, %c0_2] : memref<8x128xbf16, #tpu.memory_space<vmem>>, vector<8x128xbf16>
    %cst = arith.constant dense<0.000000e+00> : vector<16x128xf32>
    %3 = tpu.matmul %1, %2, %cst {dimension_numbers = #tpu.dot_dimension_numbers<[1], [0], [0], [1], [0, 0, 1, 1], [], []>} : vector<16x8xbf16>, vector<8x128xbf16>, vector<16x128xf32> -> vector<16x128xf32>
    %c0_3 = arith.constant 0 : index
    %c0_4 = arith.constant 0 : index
    %4 = vector.load %arg3[%c0_3, %c0_4] : memref<1x128xf32, #tpu.memory_space<vmem>>, vector<1x128xf32>
    %5 = vector.broadcast %4 : vector<1x128xf32> to vector<16x128xf32>
    %6 = arith.addf %3, %5 : vector<16x128xf32>
    %cst_5 = arith.constant 0.000000e+00 : f32
    %7 = vector.broadcast %cst_5 : f32 to vector<16x128xf32>
    %8 = arith.maximumf %6, %7 : vector<16x128xf32>
    %9 = arith.truncf %8 : vector<16x128xf32> to vector<16x128xbf16>
    %c0_6 = arith.constant 0 : index
    %c0_7 = arith.constant 0 : index
    %10 = vector.load %arg4[%c0_6, %c0_7] : memref<128x128xbf16, #tpu.memory_space<vmem>>, vector<128x128xbf16>
    %cst_8 = arith.constant dense<0.000000e+00> : vector<16x128xf32>
    %11 = tpu.matmul %9, %10, %cst_8 {dimension_numbers = #tpu.dot_dimension_numbers<[1], [0], [0], [1], [0, 0, 1, 1], [], []>} : vector<16x128xbf16>, vector<128x128xbf16>, vector<16x128xf32> -> vector<16x128xf32>
    %c0_9 = arith.constant 0 : index
    %c0_10 = arith.constant 0 : index
    %12 = vector.load %arg5[%c0_9, %c0_10] : memref<1x128xf32, #tpu.memory_space<vmem>>, vector<1x128xf32>
    %13 = vector.broadcast %12 : vector<1x128xf32> to vector<16x128xf32>
    %14 = arith.addf %11, %13 : vector<16x128xf32>
    %cst_11 = arith.constant 0.000000e+00 : f32
    %15 = vector.broadcast %cst_11 : f32 to vector<16x128xf32>
    %16 = arith.maximumf %14, %15 : vector<16x128xf32>
    %17 = arith.truncf %16 : vector<16x128xf32> to vector<16x128xbf16>
    %c0_12 = arith.constant 0 : index
    %c0_13 = arith.constant 0 : index
    %18 = vector.load %arg6[%c0_12, %c0_13] : memref<128x4xbf16, #tpu.memory_space<vmem>>, vector<128x4xbf16>
    %cst_14 = arith.constant dense<0.000000e+00> : vector<16x4xf32>
    %19 = tpu.matmul %17, %18, %cst_14 {dimension_numbers = #tpu.dot_dimension_numbers<[1], [0], [0], [1], [0, 0, 1, 1], [], []>} : vector<16x128xbf16>, vector<128x4xbf16>, vector<16x4xf32> -> vector<16x4xf32>
    %c0_15 = arith.constant 0 : index
    %c0_16 = arith.constant 0 : index
    %20 = vector.load %arg7[%c0_15, %c0_16] : memref<1x4xf32, #tpu.memory_space<vmem>>, vector<1x4xf32>
    %21 = vector.broadcast %20 : vector<1x4xf32> to vector<16x4xf32>
    %22 = arith.addf %19, %21 : vector<16x4xf32>
    %c0_17 = arith.constant 0 : index
    %c0_18 = arith.constant 0 : index
    %23 = vector.load %arg8[%c0_17, %c0_18] : memref<16x4xf32, #tpu.memory_space<vmem>>, vector<16x4xf32>
    tpu.vector_store %arg8[%c0_17, %c0_18], %22 {strides = array<i32>} : memref<16x4xf32, #tpu.memory_space<vmem>>, vector<16x4xf32>,
    return
  }
  func.func @transform_0(%arg0: i32) -> (i32, i32) {
    %c0_i32 = arith.constant 0 : i32
    %c0_i32_0 = arith.constant 0 : i32
    return %arg0, %c0_i32 : i32, i32
  }
  func.func @transform_1(%arg0: i32) -> (i32, i32) {
    %c0_i32 = arith.constant 0 : i32
    %c0_i32_0 = arith.constant 0 : i32
    %c0_i32_1 = arith.constant 0 : i32
    return %c0_i32, %c0_i32_0 : i32, i32
  }
  func.func @transform_2(%arg0: i32) -> (i32, i32) {
    %c0_i32 = arith.constant 0 : i32
    %c0_i32_0 = arith.constant 0 : i32
    %c0_i32_1 = arith.constant 0 : i32
    return %c0_i32, %c0_i32_0 : i32, i32
  }
  func.func @transform_3(%arg0: i32) -> (i32, i32) {
    %c0_i32 = arith.constant 0 : i32
    %c0_i32_0 = arith.constant 0 : i32
    %c0_i32_1 = arith.constant 0 : i32
    return %c0_i32, %c0_i32_0 : i32, i32
  }
  func.func @transform_4(%arg0: i32) -> (i32, i32) {
    %c0_i32 = arith.constant 0 : i32
    %c0_i32_0 = arith.constant 0 : i32
    %c0_i32_1 = arith.constant 0 : i32
    return %c0_i32, %c0_i32_0 : i32, i32
  }
  func.func @transform_5(%arg0: i32) -> (i32, i32) {
    %c0_i32 = arith.constant 0 : i32
    %c0_i32_0 = arith.constant 0 : i32
    %c0_i32_1 = arith.constant 0 : i32
    return %c0_i32, %c0_i32_0 : i32, i32
  }
  func.func @transform_6(%arg0: i32) -> (i32, i32) {
    %c0_i32 = arith.constant 0 : i32
    %c0_i32_0 = arith.constant 0 : i32
    %c0_i32_1 = arith.constant 0 : i32
    return %c0_i32, %c0_i32_0 : i32, i32
  }
  func.func @transform_7(%arg0: i32) -> (i32, i32) {
    %c0_i32 = arith.constant 0 : i32
    %c0_i32_0 = arith.constant 0 : i32
    return %arg0, %c0_i32 : i32, i32
  }
}

</mosaic_0001>

<bundles_post_ra>
// kernel: qnetwork_forward.1
= control target key start
LH: loop header
LB: loop body
LE: loop exit
PB: predicated region body
PF: predicated region fallthrough
CT: control target
= control target key end

     0   :  { %vm39_vm0 = vcmask 1043456   ;;  %vm35_vm1 = vcmask 64512   ;;  %vm227_vm2 = vcmask 31744   ;;  %s430_s1 = inlined_call_operand.vmem [shape: bf16[8,128], index: 1, kind: input, shape index: {}]   ;;  %s431_s0 = inlined_call_operand.vmem [shape: f32[16,8], index: 0, kind: input, shape index: {}]   ;;  %s432_s3 = inlined_call_operand.vmem [shape: bf16[128,128], index: 3, kind: input, shape index: {}]   ;;  %s433_s2 = inlined_call_operand.vmem [shape: f32[1,128], index: 2, kind: input, shape index: {}]   ;;  %s434_s4 = inlined_call_operand.vmem [shape: f32[1,128], index: 4, kind: input, shape index: {}]   ;;  %s435_s5 = inlined_call_operand.vmem [shape: bf16[128,4], index: 5, kind: input, shape index: {}]   ;;  %s436_s6 = inlined_call_operand.vmem [shape: f32[1,4], index: 6, kind: input, shape index: {}]   ;;  %s437_s7 = inlined_call_operand.vmem [shape: f32[16,4], index: 7, kind: output, shape index: {}]  }
   0x1   :  { %v30_v0 = vld [vmem:[%s430_s1] sm:$0xf]  ;;  %v28_v2 = vld [vmem:[%s431_s0 + $0x8] sm:$0xff]  ;;  %v306_v5 = vld [vmem:[%s432_s3 + $0x38] sm:$0xff] }
   0x2   :  { %v27_v1 = vld [vmem:[%s431_s0] sm:$0xff]  ;;  %v41_v3 = vsel %vm39_vm0, %v30_v0, 0  ;;  %128 = vmatpush.bf16.msra.mxu1 %v306_v5  ;;  %v305_v6 = vld [vmem:[%s432_s3 + $0x30] sm:$0xff]  ;;  %v304_v7 = vld [vmem:[%s432_s3 + $0x28] sm:$0xff] }
   0x3   :  { %v29_v4 = vpack.c.bf16 %v28_v2, %v27_v1  ;;  %50 = vmatpush.bf16.msra.mxu0 %v41_v3  ;;  %v303_v8 = vld [vmem:[%s432_s3 + $0x20] sm:$0xff]  ;;  %v302_v9 = vld [vmem:[%s432_s3 + $0x18] sm:$0xff]  ;;  %v301_v10 = vld [vmem:[%s432_s3 + $0x10] sm:$0xff] }
   0x4   :  { %v300_v11 = vld [vmem:[%s432_s3 + $0x8] sm:$0xff]  ;;  %v299_v12 = vld [vmem:[%s432_s3] sm:$0xff]  ;;  %v314_v13 = vld [vmem:[%s435_s5 + $0x38] sm:$0xff] }
   0x5   :  { %213 = vmatpush.bf16.msra.mxu2 %v314_v13  ;;  %v313_v14 = vld [vmem:[%s435_s5 + $0x30] sm:$0xff]  ;;  %v312_v15 = vld [vmem:[%s435_s5 + $0x28] sm:$0xff]  ;;  %v311_v16 = vld [vmem:[%s435_s5 + $0x20] sm:$0xff] }
   0x6   :  { %234 = vmatmul.msk.bf16.vlgmr.msra.gmra.mxu0 %vm35_vm1, %v29_v4  ;;  %129 = vmatpush.bf16.msra.mxu1 %v305_v6  ;;  %v315_v18 = vld [vmem:[%s433_s2] ss:$0 sm:$0xff]  ;;  %v310_v25 = vld [vmem:[%s435_s5 + $0x18] sm:$0xff]  ;;  %v309_v26 = vld [vmem:[%s435_s5 + $0x10] sm:$0xff] }
   0x7   :  { %v308_v27 = vld [vmem:[%s435_s5 + $0x8] sm:$0xff]  ;;  %v307_v28 = vld [vmem:[%s435_s5] sm:$0xff] }
   0x8   :  { %v316_v30 = vld [vmem:[%s434_s4] ss:$0 sm:$0xff] }
   0x9   :  { %214 = vmatpush.bf16.msra.mxu2 %v313_v14  ;;  %v317_v37 = vld [vmem:[%s436_s6] ss:$0 sm:$0xff] }
   0xa   :  { %130 = vmatpush.bf16.msra.mxu1 %v304_v7 }
   0xd   :  { %215 = vmatpush.bf16.msra.mxu2 %v312_v15 }
   0xe   :  { %131 = vmatpush.bf16.msra.mxu1 %v303_v8 }
  0x11   :  { %216 = vmatpush.bf16.msra.mxu2 %v311_v16 }
  0x12   :  { %132 = vmatpush.bf16.msra.mxu1 %v302_v9 }
  0x15   :  { %217 = vmatpush.bf16.msra.mxu2 %v310_v25 }
  0x16   :  { %133 = vmatpush.bf16.msra.mxu1 %v301_v10 }
  0x19   :  { %218 = vmatpush.bf16.msra.mxu2 %v309_v26 }
  0x1a   :  { %134 = vmatpush.bf16.msra.mxu1 %v300_v11 }
  0x1d   :  { %219 = vmatpush.bf16.msra.mxu2 %v308_v27 }
  0x1e   :  { %135 = vmatpush.bf16.msra.mxu1 %v299_v12 }
  0x21   :  { %220 = vmatpush.bf16.msra.mxu2 %v307_v28 }
  0x83   :  { %v52_v17 = vpop.f32.mrf.mxu0 }
  0x84   :  { %v53_v19 = vadd.f32 %v315_v18, %v52_v17 }
  0x86   :  { %v57_v22 = vmax.f32 %v53_v19, 0.0 }
  0x8b   :  { %v54_v20 = vpop.f32.mrf.mxu0 }
  0x8c   :  { %v55_v21 = vadd.f32 %v315_v18, %v54_v20 }
  0x8e   :  { %v58_v23 = vmax.f32 %v55_v21, 0.0 }
  0x90   :  { %v59_v24 = vpack.c.bf16 %v58_v23, %v57_v22 }
  0x92   :  { %136 = vmatmul.bf16.vlgmr.msra.gmra.mxu1 %v59_v24 }
 0x10f   :  { %v137_v29 = vpop.f32.mrf.mxu1 }
 0x110   :  { %v138_v31 = vadd.f32 %v316_v30, %v137_v29 }
 0x112   :  { %v142_v34 = vmax.f32 %v138_v31, 0.0 }
 0x117   :  { %v139_v32 = vpop.f32.mrf.mxu1 }
 0x118   :  { %v140_v33 = vadd.f32 %v316_v30, %v139_v32 }
 0x11a   :  { %v143_v35 = vmax.f32 %v140_v33, 0.0 }
 0x11c   :  { %v144_v36 = vpack.c.bf16 %v143_v35, %v142_v34 }
 0x11e   :  { %221 = vmatmul.bf16.vlgmr.msra.gmra.mxu2 %v144_v36 }
 0x1a1   :  { %v222_v38 = vpop.f32.mrf.mxu2 }
 0x1a2   :  { %v223_v39 = vadd.f32 %v317_v37, %v222_v38 }
 0x1a4   :  { %228 = vst.msk [vmem:[%s437_s7] sm:$0xff] %vm227_vm2, %v223_v39 }
 0x1a9   :  { %v224_v40 = vpop.f32.mrf.mxu2 }
 0x1aa   :  { %v225_v41 = vadd.f32 %v317_v37, %v224_v40 }
 0x1ac   :  { %229 = vst.msk [vmem:[%s437_s7 + $0x8] sm:$0xff] %vm227_vm2, %v225_v41 }

</bundles_post_ra>
